<compile_context>
chip_gen: v7x
topology: tpu7x:2x2x1
jax: 0.10.0
libtpu: 0.0.40
codegen_flags: <defaults>
</compile_context>

<pallas_src>
import jax
import jax.numpy as jnp
from jax.experimental import pallas as pl
from jax.experimental.pallas import tpu as pltpu

LANE = 128       # vreg lane width
BATCH_ALIGN = 16 # bf16 sublane packing (16 rows / packed vreg)
MAX_BLOCK_BM = 512


def mlp_kernel(x_ref, w0_ref, b0_ref, w1_ref, b1_ref, w2_ref, b2_ref, out_ref):
    # Cast x to bf16 in-kernel (keeps HBM reads at native dtype / single pass).
    x = x_ref[...].astype(jnp.bfloat16)

    # fc0 + ReLU: bf16 operands on the MXU, f32 accumulate, f32 epilogue.
    h0 = jnp.dot(x, w0_ref[...], preferred_element_type=jnp.float32) + b0_ref[...]
    h0 = jnp.maximum(h0, 0.0).astype(jnp.bfloat16)

    # fc1 + ReLU
    h1 = jnp.dot(h0, w1_ref[...], preferred_element_type=jnp.float32) + b1_ref[...]
    h1 = jnp.maximum(h1, 0.0).astype(jnp.bfloat16)

    # fc2 (lane-dense, class-padded output; no activation)
    out_ref[...] = jnp.dot(h1, w2_ref[...], preferred_element_type=jnp.float32) + b2_ref[...]


def prepare_params(w0, b0, w1, b1, w2, b2):
    """One-time layout change: PyTorch-style (out, in) weights -> (in, out) bf16 for the MXU.
    Hidden dim and class dim zero-padded to full 128-lane widths (padded units are exact
    zeros, so results are unchanged); biases as f32 (1, out) rows."""
    hidden = w0.shape[0]
    num_classes = w2.shape[0]
    hid_pad = pl.cdiv(hidden, LANE) * LANE
    nc_pad = pl.cdiv(num_classes, LANE) * LANE

    dh = hid_pad - hidden
    dc = nc_pad - num_classes

    w0t = jnp.pad(w0.T, ((0, 0), (0, dh))).astype(jnp.bfloat16)        # (in, hid_pad)
    w1t = jnp.pad(w1.T, ((0, dh), (0, dh))).astype(jnp.bfloat16)       # (hid_pad, hid_pad)
    w2t = jnp.pad(w2.T, ((0, dh), (0, dc))).astype(jnp.bfloat16)       # (hid_pad, nc_pad)

    b0r = jnp.pad(b0.astype(jnp.float32), (0, dh)).reshape(1, -1)
    b1r = jnp.pad(b1.astype(jnp.float32), (0, dh)).reshape(1, -1)
    b2r = jnp.pad(b2.astype(jnp.float32), (0, dc)).reshape(1, -1)
    return (w0t, b0r, w1t, b1r, w2t, b2r), num_classes, nc_pad


def _round_up(n, m):
    return pl.cdiv(n, m) * m


def mlp_forward(x, params, num_classes, nc_pad):
    """Fused MLP forward. Accepts x of shape (batch, *spatial) and flattens, like the
    PyTorch module (Linear over the flattened feature dim)."""
    w0t, b0r, w1t, b1r, w2t, b2r = params
    batch = x.shape[0]
    x2d = x.reshape(batch, -1)
    in_features = x2d.shape[1]
    hid_pad = w0t.shape[1]

    # Adaptive batch tiling:
    #  * 16-aligned rows (bf16 sublane packing of the in-kernel operand)
    #  * >= 2 tiles when there is enough work (so v7x's two TensorCores both run)
    #  * capped at 512 rows (amortizes per-step overhead, fits v5e's 16 MiB scoped VMEM)
    #  * tail padding bounded to < block_bm, and only in native f32 (no bf16 copy).
    pb = _round_up(batch, BATCH_ALIGN)
    if pb <= 2 * BATCH_ALIGN:
        block_bm = pb
    else:
        block_bm = min(MAX_BLOCK_BM, _round_up(pl.cdiv(pb, 2), BATCH_ALIGN))
    pb = _round_up(pb, block_bm)

    if pb != batch:
        xp = jnp.pad(x2d, ((0, pb - batch), (0, 0)))   # native dtype, no cast
    else:
        xp = x2d

    grid = (pb // block_bm,)

    flops = 2 * pb * (in_features * hid_pad + hid_pad * hid_pad + hid_pad * nc_pad)
    bytes_accessed = (
        xp.size * xp.dtype.itemsize
        + (w0t.size + w1t.size + w2t.size) * 2
        + (b0r.size + b1r.size + b2r.size) * 4
        + pb * nc_pad * 4
    )

    out_padded = pl.pallas_call(
        mlp_kernel,
        out_shape=jax.ShapeDtypeStruct((pb, nc_pad), jnp.float32),
        grid=grid,
        in_specs=[
            pl.BlockSpec((block_bm, in_features), lambda i: (i, 0)),  # x tile over batch
            pl.BlockSpec(w0t.shape, lambda i: (0, 0)),
            pl.BlockSpec(b0r.shape, lambda i: (0, 0)),
            pl.BlockSpec(w1t.shape, lambda i: (0, 0)),
            pl.BlockSpec(b1r.shape, lambda i: (0, 0)),
            pl.BlockSpec(w2t.shape, lambda i: (0, 0)),
            pl.BlockSpec(b2r.shape, lambda i: (0, 0)),
        ],
        out_specs=pl.BlockSpec((block_bm, nc_pad), lambda i: (i, 0)),
        compiler_params=pltpu.CompilerParams(dimension_semantics=("parallel",)),
        cost_estimate=pl.CostEstimate(
            flops=flops, transcendentals=0, bytes_accessed=bytes_accessed),
    )(xp, w0t, b0r, w1t, b1r, w2t, b2r)

    # Strip batch / class padding outside the kernel.
    return out_padded[:batch, :num_classes]


def init_params(key, in_features, hidden, num_classes):
    """Deterministic, PyTorch-Linear-style (uniform ±1/sqrt(fan_in)) init, (out, in) layout."""
    ks = jax.random.split(key, 6)

    def lin(kw, kb, fan_in, fan_out):
        bound = 1.0 / jnp.sqrt(float(fan_in))
        w = jax.random.uniform(kw, (fan_out, fan_in), jnp.float32, -bound, bound)
        b = jax.random.uniform(kb, (fan_out,), jnp.float32, -bound, bound)
        return w, b

    w0, b0 = lin(ks[0], ks[1], in_features, hidden)
    w1, b1 = lin(ks[2], ks[3], hidden, hidden)
    w2, b2 = lin(ks[4], ks[5], hidden, num_classes)
    return w0, b0, w1, b1, w2, b2


if __name__ == "__main__":
    key = jax.random.PRNGKey(0)
    k_x, k_p = jax.random.split(key)

    # Mirrors Model(in_shape=torch.Size([2, 4, 16, 16]), num_classes=10):
    # in_features = prod((4, 16, 16)) = 1024.
    in_shape = (2, 4, 16, 16)
    batch = in_shape[0]
    in_features = 1
    for d in in_shape[1:]:
        in_features *= d
    hidden = 32
    num_classes = 10

    x = jax.random.normal(k_x, in_shape, jnp.float32)
    w0, b0, w1, b1, w2, b2 = init_params(k_p, in_features, hidden, num_classes)

    params, nc, nc_pad = prepare_params(w0, b0, w1, b1, w2, b2)
    out = mlp_forward(x, params, nc, nc_pad)
    jax.block_until_ready(out)

    # Reference 1: same math as the kernel (bf16 operands, f32 accumulate) in plain JAX.
    x2d = x.reshape(batch, -1)

    def bf16_dot(a, b):
        return jnp.dot(a.astype(jnp.bfloat16), b.astype(jnp.bfloat16),
                       preferred_element_type=jnp.float32)

    ref_bf16 = jnp.maximum(bf16_dot(x2d, w0.T) + b0, 0.0)
    ref_bf16 = jnp.maximum(bf16_dot(ref_bf16, w1.T) + b1, 0.0)
    ref_bf16 = bf16_dot(ref_bf16, w2.T) + b2

    # Reference 2: exact PyTorch-module math in f32 (loose tolerance for bf16 operands).
    ref_f32 = jnp.maximum(x2d @ w0.T + b0, 0.0)
    ref_f32 = jnp.maximum(ref_f32 @ w1.T + b1, 0.0)
    ref_f32 = ref_f32 @ w2.T + b2

    assert out.shape == (batch, num_classes)
    assert jnp.allclose(out, ref_bf16, atol=2e-3, rtol=2e-3)
    assert jnp.allclose(out, ref_f32, atol=1e-1, rtol=1e-1)

    print("KERNEL_OK")
</pallas_src>

<mosaic_0001>
module attributes {stable_mosaic.version = 11 : i64} {
  func.func @mlp_kernel(%arg0: i32, %arg1: memref<16x1024xf32, #tpu.memory_space<vmem>>, %arg2: memref<1024x128xbf16, #tpu.memory_space<vmem>>, %arg3: memref<1x128xf32, #tpu.memory_space<vmem>>, %arg4: memref<128x128xbf16, #tpu.memory_space<vmem>>, %arg5: memref<1x128xf32, #tpu.memory_space<vmem>>, %arg6: memref<128x128xbf16, #tpu.memory_space<vmem>>, %arg7: memref<1x128xf32, #tpu.memory_space<vmem>>, %arg8: memref<16x128xf32, #tpu.memory_space<vmem>>) attributes {dimension_semantics = [#tpu.dimension_semantics<parallel>], iteration_bounds = array<i64: 1>, scalar_prefetch = 0 : i64, scratch_operands = 0 : i64, tpu.core_type = #tpu.core_type<tc>, window_params = [{transform_indices = @transform_0, window_bounds = array<i64: 16, 1024>}, {pipeline_mode = #tpu.pipeline_mode<synchronous>, transform_indices = @transform_1, window_bounds = array<i64: 1024, 128>}, {pipeline_mode = #tpu.pipeline_mode<synchronous>, transform_indices = @transform_2, window_bounds = array<i64: 1, 128>}, {pipeline_mode = #tpu.pipeline_mode<synchronous>, transform_indices = @transform_3, window_bounds = array<i64: 128, 128>}, {pipeline_mode = #tpu.pipeline_mode<synchronous>, transform_indices = @transform_4, window_bounds = array<i64: 1, 128>}, {pipeline_mode = #tpu.pipeline_mode<synchronous>, transform_indices = @transform_5, window_bounds = array<i64: 128, 128>}, {pipeline_mode = #tpu.pipeline_mode<synchronous>, transform_indices = @transform_6, window_bounds = array<i64: 1, 128>}, {transform_indices = @transform_7, window_bounds = array<i64: 16, 128>}]} {
    %c0 = arith.constant 0 : index
    %c0_0 = arith.constant 0 : index
    %0 = vector.load %arg1[%c0, %c0_0] : memref<16x1024xf32, #tpu.memory_space<vmem>>, vector<16x1024xf32>
    %1 = arith.truncf %0 : vector<16x1024xf32> to vector<16x1024xbf16>
    %c0_1 = arith.constant 0 : index
    %c0_2 = arith.constant 0 : index
    %2 = vector.load %arg2[%c0_1, %c0_2] : memref<1024x128xbf16, #tpu.memory_space<vmem>>, vector<1024x128xbf16>
    %cst = arith.constant dense<0.000000e+00> : vector<16x128xf32>
    %3 = tpu.matmul %1, %2, %cst {dimension_numbers = #tpu.dot_dimension_numbers<[1], [0], [0], [1], [0, 0, 1, 1], [], []>} : vector<16x1024xbf16>, vector<1024x128xbf16>, vector<16x128xf32> -> vector<16x128xf32>
    %c0_3 = arith.constant 0 : index
    %c0_4 = arith.constant 0 : index
    %4 = vector.load %arg3[%c0_3, %c0_4] : memref<1x128xf32, #tpu.memory_space<vmem>>, vector<1x128xf32>
    %5 = vector.broadcast %4 : vector<1x128xf32> to vector<16x128xf32>
    %6 = arith.addf %3, %5 : vector<16x128xf32>
    %cst_5 = arith.constant 0.000000e+00 : f32
    %7 = vector.broadcast %cst_5 : f32 to vector<16x128xf32>
    %8 = arith.maximumf %6, %7 : vector<16x128xf32>
    %9 = arith.truncf %8 : vector<16x128xf32> to vector<16x128xbf16>
    %c0_6 = arith.constant 0 : index
    %c0_7 = arith.constant 0 : index
    %10 = vector.load %arg4[%c0_6, %c0_7] : memref<128x128xbf16, #tpu.memory_space<vmem>>, vector<128x128xbf16>
    %cst_8 = arith.constant dense<0.000000e+00> : vector<16x128xf32>
    %11 = tpu.matmul %9, %10, %cst_8 {dimension_numbers = #tpu.dot_dimension_numbers<[1], [0], [0], [1], [0, 0, 1, 1], [], []>} : vector<16x128xbf16>, vector<128x128xbf16>, vector<16x128xf32> -> vector<16x128xf32>
    %c0_9 = arith.constant 0 : index
    %c0_10 = arith.constant 0 : index
    %12 = vector.load %arg5[%c0_9, %c0_10] : memref<1x128xf32, #tpu.memory_space<vmem>>, vector<1x128xf32>
    %13 = vector.broadcast %12 : vector<1x128xf32> to vector<16x128xf32>
    %14 = arith.addf %11, %13 : vector<16x128xf32>
    %cst_11 = arith.constant 0.000000e+00 : f32
    %15 = vector.broadcast %cst_11 : f32 to vector<16x128xf32>
    %16 = arith.maximumf %14, %15 : vector<16x128xf32>
    %17 = arith.truncf %16 : vector<16x128xf32> to vector<16x128xbf16>
    %c0_12 = arith.constant 0 : index
    %c0_13 = arith.constant 0 : index
    %18 = vector.load %arg6[%c0_12, %c0_13] : memref<128x128xbf16, #tpu.memory_space<vmem>>, vector<128x128xbf16>
    %cst_14 = arith.constant dense<0.000000e+00> : vector<16x128xf32>
    %19 = tpu.matmul %17, %18, %cst_14 {dimension_numbers = #tpu.dot_dimension_numbers<[1], [0], [0], [1], [0, 0, 1, 1], [], []>} : vector<16x128xbf16>, vector<128x128xbf16>, vector<16x128xf32> -> vector<16x128xf32>
    %c0_15 = arith.constant 0 : index
    %c0_16 = arith.constant 0 : index
    %20 = vector.load %arg7[%c0_15, %c0_16] : memref<1x128xf32, #tpu.memory_space<vmem>>, vector<1x128xf32>
    %21 = vector.broadcast %20 : vector<1x128xf32> to vector<16x128xf32>
    %22 = arith.addf %19, %21 : vector<16x128xf32>
    %c0_17 = arith.constant 0 : index
    %c0_18 = arith.constant 0 : index
    %23 = vector.load %arg8[%c0_17, %c0_18] : memref<16x128xf32, #tpu.memory_space<vmem>>, vector<16x128xf32>
    tpu.vector_store %arg8[%c0_17, %c0_18], %22 {strides = array<i32>} : memref<16x128xf32, #tpu.memory_space<vmem>>, vector<16x128xf32>,
    return
  }
  func.func @transform_0(%arg0: i32) -> (i32, i32) {
    %c0_i32 = arith.constant 0 : i32
    %c0_i32_0 = arith.constant 0 : i32
    return %arg0, %c0_i32 : i32, i32
  }
  func.func @transform_1(%arg0: i32) -> (i32, i32) {
    %c0_i32 = arith.constant 0 : i32
    %c0_i32_0 = arith.constant 0 : i32
    %c0_i32_1 = arith.constant 0 : i32
    return %c0_i32, %c0_i32_0 : i32, i32
  }
  func.func @transform_2(%arg0: i32) -> (i32, i32) {
    %c0_i32 = arith.constant 0 : i32
    %c0_i32_0 = arith.constant 0 : i32
    %c0_i32_1 = arith.constant 0 : i32
    return %c0_i32, %c0_i32_0 : i32, i32
  }
  func.func @transform_3(%arg0: i32) -> (i32, i32) {
    %c0_i32 = arith.constant 0 : i32
    %c0_i32_0 = arith.constant 0 : i32
    %c0_i32_1 = arith.constant 0 : i32
    return %c0_i32, %c0_i32_0 : i32, i32
  }
  func.func @transform_4(%arg0: i32) -> (i32, i32) {
    %c0_i32 = arith.constant 0 : i32
    %c0_i32_0 = arith.constant 0 : i32
    %c0_i32_1 = arith.constant 0 : i32
    return %c0_i32, %c0_i32_0 : i32, i32
  }
  func.func @transform_5(%arg0: i32) -> (i32, i32) {
    %c0_i32 = arith.constant 0 : i32
    %c0_i32_0 = arith.constant 0 : i32
    %c0_i32_1 = arith.constant 0 : i32
    return %c0_i32, %c0_i32_0 : i32, i32
  }
  func.func @transform_6(%arg0: i32) -> (i32, i32) {
    %c0_i32 = arith.constant 0 : i32
    %c0_i32_0 = arith.constant 0 : i32
    %c0_i32_1 = arith.constant 0 : i32
    return %c0_i32, %c0_i32_0 : i32, i32
  }
  func.func @transform_7(%arg0: i32) -> (i32, i32) {
    %c0_i32 = arith.constant 0 : i32
    %c0_i32_0 = arith.constant 0 : i32
    return %arg0, %c0_i32 : i32, i32
  }
}

</mosaic_0001>

<bundles_post_ra>
// kernel: tpu_custom_call.1
= control target key start
LH: loop header
LB: loop body
LE: loop exit
PB: predicated region body
PF: predicated region fallthrough
CT: control target
= control target key end

     0   :  { %12 = vsyncpa [#allocation3], 0  ;;  %s1629_s0 = inlined_call_operand.hbm [shape: f32[16,1024], index: 0, kind: input, shape index: {}]   ;;  %s1630_s1 = inlined_call_operand.hbm [shape: bf16[1024,128], index: 1, kind: input, shape index: {}]   ;;  %s1631_s2 = inlined_call_operand.vmem [shape: f32[1,128], index: 2, kind: input, shape index: {}]   ;;  %s1632_s3 = inlined_call_operand.hbm [shape: bf16[128,128], index: 3, kind: input, shape index: {}]   ;;  %s1633_s4 = inlined_call_operand.vmem [shape: f32[1,128], index: 4, kind: input, shape index: {}]   ;;  %s1634_s5 = inlined_call_operand.hbm [shape: bf16[128,128], index: 5, kind: input, shape index: {}]   ;;  %s1635_s6 = inlined_call_operand.vmem [shape: f32[1,128], index: 6, kind: input, shape index: {}]   ;;  %s1636_s7 = inlined_call_operand.hbm [shape: f32[16,128], index: 7, kind: output, shape index: {}]  }
   0x1   :  { %13 = vsyncpa [#allocation6], 0 }
   0x2   :  { %14 = vsyncpa [#allocation9], 0 }
   0x3   :  { %15 = vsyncpa [#allocation4], 0  ;;  %s1480_s24 = smov [#allocation5]   ;;  %s1362_s28 = scalar_lea.hbm %s1630_s1, 8192 }
   0x4   :  { %s33_s25 = sshll.u32 %s1480_s24, 4  ;;  %p1363_p0 = scmp.ne.s32.totalorder %s1630_s1, %s1362_s28  ;;  %s34_s25 = int_to_ptr.vmem [resolvable:$true] %s33_s25 }
   0x5   :  { %p1366_p1 = scmp.lt.u32.totalorder %s1362_s28, %s1630_s1 }
   0x7   :  { %p1368_p2 = pnand %p1366_p1, %p1363_p0 }
   0x9   :  { %1371 = shalt.err (!%p1368_p2)
}
   0xa   :  { %s1372_s10 = scalar_lea.vmem %s34_s25, 8192  ;;  %p1377_p4 = scmp.lt.s32.totalorder %s34_s25, %s34_s25 }
   0xb   :  { %p1373_p3 = scmp.ne.s32.totalorder %s34_s25, %s1372_s10  ;;  %p1378_p5 = scmp.lt.s32.totalorder %s1372_s10, %s1372_s10 }
   0xd   :  { %p1379_p6 = por %p1378_p5, %p1377_p4 }
   0xf   :  { %p1380_p7 = pnand %p1379_p6, %p1373_p3 }
  0x11   :  { %1383 = shalt.err (!%p1380_p7)
}
  0x12   :  { %s1481_s11 = smov 64   ;;  %s1482_s12 = smov 4  }
  0x13   :  { %39 = dma.hbm_to_vmem [thread:$0]  %s1630_s1, 8192, %s34_s25, [#allocation6], %s1481_s11, %s1481_s11, %s1482_s12  }
  0x14   :  { %s1483_s15 = smov [#allocation2]   ;;  %s1384_s19 = scalar_lea.hbm %s1629_s0, 2048 }
  0x15   :  { %s21_s16 = sshll.u32 %s1483_s15, 4  ;;  %p1385_p8 = scmp.ne.s32.totalorder %s1629_s0, %s1384_s19  ;;  %s22_s16 = int_to_ptr.vmem [resolvable:$true] %s21_s16 }
  0x16   :  { %p1388_p9 = scmp.lt.u32.totalorder %s1384_s19, %s1629_s0 }
  0x18   :  { %p1390_p10 = pnand %p1388_p9, %p1385_p8 }
  0x1a   :  { %1393 = shalt.err (!%p1390_p10)
}
  0x1b   :  { %s1394_s24 = scalar_lea.vmem %s22_s16, 2048  ;;  %p1399_p12 = scmp.lt.s32.totalorder %s22_s16, %s22_s16 }
  0x1c   :  { %p1395_p11 = scmp.ne.s32.totalorder %s22_s16, %s1394_s24  ;;  %p1400_p13 = scmp.lt.s32.totalorder %s1394_s24, %s1394_s24 }
  0x1e   :  { %p1401_p0 = por %p1400_p13, %p1399_p12 }
  0x20   :  { %p1402_p1 = pnand %p1401_p0, %p1395_p11 }
  0x22   :  { %1405 = shalt.err (!%p1402_p1)
}
  0x23   :  { %s1484_s1 = smov 1024   ;;  %s1485_s27 = smov [#allocation7]  }
  0x24   :  { %27 = dma.hbm_to_vmem [thread:$0]  %s1629_s0, 2048, %s22_s16, [#allocation3], %s1484_s1, %s1484_s1, %s1481_s11  }
  0x25   :  { %s47_s28 = sshll.u32 %s1485_s27, 4  ;;  %s1486_s29 = smov [#allocation8]   ;;  %s48_s28 = int_to_ptr.vmem [resolvable:$true] %s47_s28 }
  0x26   :  { %s61_s30 = sshll.u32 %s1486_s29, 4  ;;  %s1406_s10 = scalar_lea.hbm %s1632_s3, 1024  ;;  %s62_s30 = int_to_ptr.vmem [resolvable:$true] %s61_s30 }
  0x27   :  { %p1407_p2 = scmp.ne.s32.totalorder %s1632_s3, %s1406_s10  ;;  %p1410_p3 = scmp.lt.u32.totalorder %s1406_s10, %s1632_s3 }
  0x29   :  { %p1412_p4 = pnand %p1410_p3, %p1407_p2 }
  0x2b   :  { %1415 = shalt.err (!%p1412_p4)
}
  0x2c   :  { %s1416_s0 = scalar_lea.vmem %s48_s28, 1024  ;;  %p1421_p6 = scmp.lt.s32.totalorder %s48_s28, %s48_s28 }
  0x2d   :  { %p1417_p5 = scmp.ne.s32.totalorder %s48_s28, %s1416_s0  ;;  %p1422_p7 = scmp.lt.s32.totalorder %s1416_s0, %s1416_s0 }
  0x2f   :  { %p1423_p8 = por %p1422_p7, %p1421_p6 }
  0x31   :  { %p1424_p9 = pnand %p1423_p8, %p1417_p5 }
  0x33   :  { %1427 = shalt.err (!%p1424_p9)
}
  0x34   :  { %53 = dma.hbm_to_vmem [thread:$0]  %s1632_s3, 1024, %s48_s28, [#allocation6], %s1481_s11, %s1481_s11, %s1482_s12  }
  0x35   :  { %s1428_s21 = scalar_lea.hbm %s1634_s5, 1024 }
  0x36   :  { %p1429_p10 = scmp.ne.s32.totalorder %s1634_s5, %s1428_s21  ;;  %p1432_p11 = scmp.lt.u32.totalorder %s1428_s21, %s1634_s5 }
  0x38   :  { %p1434_p12 = pnand %p1432_p11, %p1429_p10 }
  0x3a   :  { %1437 = shalt.err (!%p1434_p12)
}
  0x3b   :  { %s1438_s25 = scalar_lea.vmem %s62_s30, 1024  ;;  %p1443_p0 = scmp.lt.s32.totalorder %s62_s30, %s62_s30 }
  0x3c   :  { %p1439_p13 = scmp.ne.s32.totalorder %s62_s30, %s1438_s25  ;;  %p1444_p1 = scmp.lt.s32.totalorder %s1438_s25, %s1438_s25 }
  0x3e   :  { %p1445_p2 = por %p1444_p1, %p1443_p0 }
  0x40   :  { %p1446_p3 = pnand %p1445_p2, %p1439_p13 }
  0x42   :  { %1449 = shalt.err (!%p1446_p3)
}
  0x43   :  { %67 = dma.hbm_to_vmem [thread:$0]  %s1634_s5, 1024, %s62_s30, [#allocation9], %s1481_s11, %s1481_s11, %s1482_s12  }
  0x44   :  { %1472 = dma.done.wait [#allocation3], 2048  }
  0x45   :  { %1473 = vsyncadd [#allocation3], 4294965248 }
  0x46   :  { %1474 = dma.done.wait [#allocation6], 9216  }
  0x47   :  { %1475 = vsyncadd [#allocation6], 4294958080 }
  0x48   :  { %1476 = dma.done.wait [#allocation9], 1024  }
  0x49   :  { %1477 = vsyncadd [#allocation9], 4294966272  ;;  %v1282_v0 = vld [vmem:[#allocation5 + $0x40] sm:$0xff]   ;;  %v1286_v4 = vld [vmem:[#allocation5 + $0x48] sm:$0xff]   ;;  %vm1488_vm0 = vmmov 0   ;;  %s1489_s29 = smov [#allocation10]  }
  0x4a   :  { %v1283_v1 = vld [vmem:[#allocation5 + $0xc0] sm:$0xff]   ;;  %1124 = vmatprep.subr.bf16.mxu0 %v1282_v0  ;;  %v1287_v5 = vld [vmem:[#allocation5 + $0xc8] sm:$0xff]   ;;  %v1290_v8 = vld [vmem:[#allocation5 + $0x50] sm:$0xff]   ;;  %s1027_s30 = sshll.u32 %s1489_s29, 4  ;;  %s1028_s30 = int_to_ptr.vmem [resolvable:$true] %s1027_s30 }
  0x4b   :  { %v1284_v2 = vld [vmem:[#allocation5] sm:$0xff]   ;;  %1146 = vmatprep.subr.bf16.mxu1 %v1283_v1  ;;  %v1288_v6 = vld [vmem:[#allocation5 + $0x8] sm:$0xff]   ;;  %v1291_v9 = vld [vmem:[#allocation5 + $0xd0] sm:$0xff]   ;;  %p1455_p5 = scmp.lt.s32.totalorder %s1028_s30, %s1028_s30 }
  0x4c   :  { %v1285_v3 = vld [vmem:[#allocation5 + $0x80] sm:$0xff]   ;;  %1125 = vmatpush3.bf16.msra.mxu0 %v1284_v2  ;;  %v1289_v7 = vld [vmem:[#allocation5 + $0x88] sm:$0xff]   ;;  %v1292_v10 = vld [vmem:[#allocation5 + $0x10] sm:$0xff]  }
  0x4d   :  { %1147 = vmatpush3.bf16.msra.mxu1 %v1285_v3  ;;  %1126 = vmatprep.subr.bf16.mxu0 %v1286_v4  ;;  %v1293_v11 = vld [vmem:[#allocation5 + $0x90] sm:$0xff]   ;;  %v1294_v12 = vld [vmem:[#allocation5 + $0x58] sm:$0xff]   ;;  %v1298_v16 = vld [vmem:[#allocation5 + $0x60] sm:$0xff]  }
  0x4e   :  { %1148 = vmatprep.subr.bf16.mxu1 %v1287_v5  ;;  %v1295_v13 = vld [vmem:[#allocation5 + $0xd8] sm:$0xff]   ;;  %v1299_v17 = vld [vmem:[#allocation5 + $0xe0] sm:$0xff]   ;;  %v1302_v20 = vld [vmem:[#allocation5 + $0x68] sm:$0xff]  }
  0x4f   :  { %v1296_v14 = vld [vmem:[#allocation5 + $0x18] sm:$0xff]   ;;  %v1300_v18 = vld [vmem:[#allocation5 + $0x20] sm:$0xff]   ;;  %v1303_v21 = vld [vmem:[#allocation5 + $0xe8] sm:$0xff]  }
  0x50   :  { %1127 = vmatpush3.bf16.msra.mxu0 %v1288_v6  ;;  %v1297_v15 = vld [vmem:[#allocation5 + $0x98] sm:$0xff]   ;;  %v1301_v19 = vld [vmem:[#allocation5 + $0xa0] sm:$0xff]   ;;  %v1304_v22 = vld [vmem:[#allocation5 + $0x28] sm:$0xff]  }
  0x51   :  { %1149 = vmatpush3.bf16.msra.mxu1 %v1289_v7  ;;  %1128 = vmatprep.subr.bf16.mxu0 %v1290_v8  ;;  %v1305_v23 = vld [vmem:[#allocation5 + $0xa8] sm:$0xff]   ;;  %v1306_v24 = vld [vmem:[#allocation5 + $0x70] sm:$0xff]   ;;  %v1310_v28 = vld [vmem:[#allocation5 + $0x78] sm:$0xff]  }
  0x52   :  { %1150 = vmatprep.subr.bf16.mxu1 %v1291_v9  ;;  %v1307_v25 = vld [vmem:[#allocation5 + $0xf0] sm:$0xff]   ;;  %v1311_v29 = vld [vmem:[#allocation5 + $0xf8] sm:$0xff]   ;;  %v84_v32 = vld [vmem:[#allocation2 + $0x8] sm:$0xff] }
  0x53   :  { %v1308_v26 = vld [vmem:[#allocation5 + $0x30] sm:$0xff]   ;;  %v1312_v30 = vld [vmem:[#allocation5 + $0x38] sm:$0xff]   ;;  %v92_v33 = vld [vmem:[#allocation2 + $0x48] sm:$0xff] }
  0x54   :  { %1129 = vmatpush3.bf16.msra.mxu0 %v1292_v10  ;;  %v1309_v27 = vld [vmem:[#allocation5 + $0xb0] sm:$0xff]   ;;  %v1313_v31 = vld [vmem:[#allocation5 + $0xb8] sm:$0xff]   ;;  %v100_v35 = vpack.c.bf16 %v92_v33, %v84_v32  ;;  %v83_v37 = vld [vmem:[#allocation2] sm:$0xff] }
  0x55   :  { %1151 = vmatpush3.bf16.msra.mxu1 %v1293_v11  ;;  %1130 = vmatprep.subr.bf16.mxu0 %v1294_v12  ;;  %v86_v34 = vld [vmem:[#allocation2 + $0x18] sm:$0xff]  ;;  %v91_v38 = vld [vmem:[#allocation2 + $0x40] sm:$0xff]  ;;  %v85_v41 = vld [vmem:[#allocation2 + $0x10] sm:$0xff] }
  0x56   :  { %1152 = vmatprep.subr.bf16.mxu1 %v1295_v13  ;;  %v94_v36 = vld [vmem:[#allocation2 + $0x58] sm:$0xff]  ;;  %v99_v40 = vpack.c.bf16 %v91_v38, %v83_v37  ;;  %v93_v42 = vld [vmem:[#allocation2 + $0x50] sm:$0xff]  ;;  %658 = vmatprep.mubr.bf16.mxu0 %v100_v35  ;;  %v1314_v44 = vld [vmem:[#allocation5 + $0x140] sm:$0xff]  }
  0x57   :  { %v102_v39 = vpack.c.bf16 %v94_v36, %v86_v34  ;;  %v101_v43 = vpack.c.bf16 %v93_v42, %v85_v41  ;;  %v1315_v45 = vld [vmem:[#allocation5 + $0x1c0] sm:$0xff]   ;;  %v1318_v48 = vld [vmem:[#allocation5 + $0x148] sm:$0xff]   ;;  %v1322_v52 = vld [vmem:[#allocation5 + $0x150] sm:$0xff]  }
  0x58   :  { %1131 = vmatpush3.bf16.msra.mxu0 %v1296_v14  ;;  %v1316_v46 = vld [vmem:[#allocation5 + $0x100] sm:$0xff]   ;;  %v1319_v49 = vld [vmem:[#allocation5 + $0x1c8] sm:$0xff]   ;;  %v1323_v53 = vld [vmem:[#allocation5 + $0x1d0] sm:$0xff]  }
  0x59   :  { %1153 = vmatpush3.bf16.msra.mxu1 %v1297_v15  ;;  %1132 = vmatprep.subr.bf16.mxu0 %v1298_v16  ;;  %v1317_v47 = vld [vmem:[#allocation5 + $0x180] sm:$0xff]   ;;  %v1320_v50 = vld [vmem:[#allocation5 + $0x108] sm:$0xff]   ;;  %v1324_v54 = vld [vmem:[#allocation5 + $0x110] sm:$0xff]  }
  0x5a   :  { %1154 = vmatprep.subr.bf16.mxu1 %v1299_v17  ;;  %699 = vmatprep.mubr.bf16.mxu1 %v102_v39  ;;  %v1321_v51 = vld [vmem:[#allocation5 + $0x188] sm:$0xff]   ;;  %v1325_v55 = vld [vmem:[#allocation5 + $0x190] sm:$0xff]   ;;  %v1326_v56 = vld [vmem:[#allocation5 + $0x158] sm:$0xff]  }
  0x5b   :  { %v1327_v57 = vld [vmem:[#allocation5 + $0x1d8] sm:$0xff]   ;;  %v1330_v60 = vld [vmem:[#allocation5 + $0x160] sm:$0xff]   ;;  %v1334_v0 = vld [vmem:[#allocation5 + $0x168] sm:$0xff]  }
  0x5c   :  { %1133 = vmatpush3.bf16.msra.mxu0 %v1300_v18  ;;  %v1328_v58 = vld [vmem:[#allocation5 + $0x118] sm:$0xff]   ;;  %v1331_v61 = vld [vmem:[#allocation5 + $0x1e0] sm:$0xff]   ;;  %v1335_v1 = vld [vmem:[#allocation5 + $0x1e8] sm:$0xff]  }
  0x5d   :  { %1155 = vmatpush3.bf16.msra.mxu1 %v1301_v19  ;;  %1134 = vmatprep.subr.bf16.mxu0 %v1302_v20  ;;  %v1329_v59 = vld [vmem:[#allocation5 + $0x198] sm:$0xff]   ;;  %v1332_v62 = vld [vmem:[#allocation5 + $0x120] sm:$0xff]   ;;  %v1336_v2 = vld [vmem:[#allocation5 + $0x128] sm:$0xff]  }
  0x5e   :  { %1156 = vmatprep.subr.bf16.mxu1 %v1303_v21  ;;  %v1333_v63 = vld [vmem:[#allocation5 + $0x1a0] sm:$0xff]   ;;  %v1337_v3 = vld [vmem:[#allocation5 + $0x1a8] sm:$0xff]   ;;  %v1338_v4 = vld [vmem:[#allocation5 + $0x170] sm:$0xff]  }
  0x5f   :  { %v1339_v5 = vld [vmem:[#allocation5 + $0x1f0] sm:$0xff]   ;;  %v1342_v8 = vld [vmem:[#allocation5 + $0x178] sm:$0xff]   ;;  %v88_v12 = vld [vmem:[#allocation2 + $0x28] sm:$0xff] }
  0x60   :  { %1135 = vmatpush3.bf16.msra.mxu0 %v1304_v22  ;;  %v1340_v6 = vld [vmem:[#allocation5 + $0x130] sm:$0xff]   ;;  %v1343_v9 = vld [vmem:[#allocation5 + $0x1f8] sm:$0xff]   ;;  %v96_v13 = vld [vmem:[#allocation2 + $0x68] sm:$0xff] }
  0x61   :  { %1157 = vmatpush3.bf16.msra.mxu1 %v1305_v23  ;;  %1136 = vmatprep.subr.bf16.mxu0 %v1306_v24  ;;  %v1341_v7 = vld [vmem:[#allocation5 + $0x1b0] sm:$0xff]   ;;  %v1344_v10 = vld [vmem:[#allocation5 + $0x138] sm:$0xff]   ;;  %v104_v16 = vpack.c.bf16 %v96_v13, %v88_v12  ;;  %v87_v18 = vld [vmem:[#allocation2 + $0x20] sm:$0xff] }
  0x62   :  { %1158 = vmatprep.subr.bf16.mxu1 %v1307_v25  ;;  %v1345_v11 = vld [vmem:[#allocation5 + $0x1b8] sm:$0xff]   ;;  %v95_v19 = vld [vmem:[#allocation2 + $0x60] sm:$0xff]  ;;  %v89_v20 = vld [vmem:[#allocation2 + $0x30] sm:$0xff]  ;;  %v1487_v25 = vmov 0.0  }
  0x63   :  { %v90_v14 = vld [vmem:[#allocation2 + $0x38] sm:$0xff]  ;;  %v103_v21 = vpack.c.bf16 %v95_v19, %v87_v18  ;;  %v97_v22 = vld [vmem:[#allocation2 + $0x70] sm:$0xff]  ;;  %v1346_v24 = vld [vmem:[#allocation7] sm:$0xff]  }
  0x64   :  { %1137 = vmatpush3.bf16.msra.mxu0 %v1308_v26  ;;  %v98_v15 = vld [vmem:[#allocation2 + $0x78] sm:$0xff]  ;;  %v105_v23 = vpack.c.bf16 %v97_v22, %v89_v20  ;;  %v1347_v26 = vld [vmem:[#allocation7 + $0x8] sm:$0xff]   ;;  %v1354_v33 = vld [vmem:[#allocation8] sm:$0xff]  }
  0x65   :  { %1159 = vmatpush3.bf16.msra.mxu1 %v1309_v27  ;;  %1138 = vmatprep.subr.bf16.mxu0 %v1310_v28  ;;  %v106_v17 = vpack.c.bf16 %v98_v15, %v90_v14  ;;  %v1348_v27 = vld [vmem:[#allocation7 + $0x10] sm:$0xff]   ;;  %v1349_v28 = vld [vmem:[#allocation7 + $0x18] sm:$0xff]   ;;  %v1355_v34 = vld [vmem:[#allocation8 + $0x8] sm:$0xff]  }
  0x66   :  { %1160 = vmatprep.subr.bf16.mxu1 %v1311_v29  ;;  %v1350_v29 = vld [vmem:[#allocation7 + $0x20] sm:$0xff]   ;;  %v1353_v32 = vld [vmem:[#allocation7 + $0x38] sm:$0xff]   ;;  %v1356_v35 = vld [vmem:[#allocation8 + $0x10] sm:$0xff]  }
  0x67   :  { %v1357_v36 = vld [vmem:[#allocation8 + $0x18] sm:$0xff]   ;;  %v1358_v37 = vld [vmem:[#allocation8 + $0x20] sm:$0xff]   ;;  %v1359_v38 = vld [vmem:[#allocation8 + $0x28] sm:$0xff]  }
  0x68   :  { %1139 = vmatpush3.bf16.msra.mxu0 %v1312_v30  ;;  %v1351_v30 = vld [vmem:[#allocation7 + $0x28] sm:$0xff]   ;;  %v1041_v41 = vld [vmem:[%s1631_s2] ss:$0 sm:$0xff]  ;;  %v1361_v12 = vld [vmem:[#allocation8 + $0x38] sm:$0xff]  }
  0x69   :  { %1161 = vmatpush3.bf16.msra.mxu1 %v1313_v31  ;;  %1168 = vmatprep.subr.bf16.mxu0 %v1314_v44  ;;  %v1352_v31 = vld [vmem:[#allocation7 + $0x30] sm:$0xff]   ;;  %v1106_v13 = vld [vmem:[%s1633_s4] ss:$0 sm:$0xff]  ;;  %s1450_s4 = scalar_lea.vmem %s1028_s30, 256 }
  0x6a   :  { %1190 = vmatprep.subr.bf16.mxu1 %v1315_v45  ;;  %p1451_p4 = scmp.ne.s32.totalorder %s1028_s30, %s1450_s4  ;;  %p1456_p6 = scmp.lt.s32.totalorder %s1450_s4, %s1450_s4 }
  0x6b   :  { %659 = vmatmul.mubr.bf16.vlgmr.msra.gmra.mrb[0].mxu0 %v99_v40 }
  0x6c   :  { %700 = vmatmul.mubr.bf16.vlgmr.msra.gmra.mrb[0].mxu1 %v101_v43  ;;  %1169 = vmatpush3.bf16.msra.mxu0 %v1316_v46  ;;  %p1457_p7 = por %p1456_p6, %p1455_p5 }
  0x6d   :  { %1191 = vmatpush3.bf16.msra.mxu1 %v1317_v47  ;;  %1170 = vmatprep.subr.bf16.mxu0 %v1318_v48 }
  0x6e   :  { %1192 = vmatprep.subr.bf16.mxu1 %v1319_v49  ;;  %740 = vmatprep.mubr.bf16.mxu0 %v104_v16  ;;  %p1458_p8 = pnand %p1457_p7, %p1451_p4 }
  0x6f   :  { %781 = vmatprep.mubr.bf16.mxu1 %v106_v17 }
  0x70   :  { %1171 = vmatpush3.bf16.msra.mxu0 %v1320_v50 }
  0x71   :  { %1193 = vmatpush3.bf16.msra.mxu1 %v1321_v51  ;;  %1172 = vmatprep.subr.bf16.mxu0 %v1322_v52 }
  0x72   :  { %1194 = vmatprep.subr.bf16.mxu1 %v1323_v53 }
  0x74   :  { %1173 = vmatpush3.bf16.msra.mxu0 %v1324_v54 }
  0x75   :  { %1195 = vmatpush3.bf16.msra.mxu1 %v1325_v55  ;;  %1174 = vmatprep.subr.bf16.mxu0 %v1326_v56 }
  0x76   :  { %1196 = vmatprep.subr.bf16.mxu1 %v1327_v57 }
  0x78   :  { %1175 = vmatpush3.bf16.msra.mxu0 %v1328_v58 }
  0x79   :  { %1197 = vmatpush3.bf16.msra.mxu1 %v1329_v59  ;;  %1176 = vmatprep.subr.bf16.mxu0 %v1330_v60 }
  0x7a   :  { %1198 = vmatprep.subr.bf16.mxu1 %v1331_v61 }
  0x7c   :  { %1177 = vmatpush3.bf16.msra.mxu0 %v1332_v62 }
  0x7d   :  { %1199 = vmatpush3.bf16.msra.mxu1 %v1333_v63  ;;  %1178 = vmatprep.subr.bf16.mxu0 %v1334_v0 }
  0x7e   :  { %1200 = vmatprep.subr.bf16.mxu1 %v1335_v1 }
  0x80   :  { %1179 = vmatpush3.bf16.msra.mxu0 %v1336_v2 }
  0x81   :  { %1201 = vmatpush3.bf16.msra.mxu1 %v1337_v3  ;;  %1180 = vmatprep.subr.bf16.mxu0 %v1338_v4 }
  0x82   :  { %1202 = vmatprep.subr.bf16.mxu1 %v1339_v5 }
  0x84   :  { %1181 = vmatpush3.bf16.msra.mxu0 %v1340_v6 }
  0x85   :  { %1203 = vmatpush3.bf16.msra.mxu1 %v1341_v7  ;;  %1182 = vmatprep.subr.bf16.mxu0 %v1342_v8 }
  0x86   :  { %1204 = vmatprep.subr.bf16.mxu1 %v1343_v9 }
  0x88   :  { %1183 = vmatpush3.bf16.msra.mxu0 %v1344_v10 }
  0x89   :  { %1205 = vmatpush3.bf16.msra.mxu1 %v1345_v11  ;;  %1230 = vmatprep.subr.bf16.mxu0 %v1487_v25  ;;  %v1360_v11 = vld [vmem:[#allocation8 + $0x30] sm:$0xff]  }
  0x8a   :  { %1250 = vmatprep.subr.bf16.mxu1 %v1487_v25 }
  0x8b   :  { %741 = vmatmul.mubr.bf16.vlgmr.msra.gmra.mrb[4].mxu0 %v103_v21 }
  0x8c   :  { %782 = vmatmul.mubr.bf16.vlgmr.msra.gmra.mrb[4].mxu1 %v105_v23  ;;  %1231 = vmatpush3.bf16.msra.mxu0 %v1346_v24  ;;  %v1115_v23 = vld [vmem:[%s1635_s6] ss:$0 sm:$0xff] }
  0x8d   :  { %1232 = vmatprep.subr.bf16.mxu0 %v1487_v25  ;;  %1246 = vmatprep.mubr.msk.bf16.mxu0 %vm1488_vm0, %v1487_v25 }
  0x8e   :  { %1266 = vmatprep.mubr.msk.bf16.mxu1 %vm1488_vm0, %v1487_v25  ;;  %1251 = vmatpush3.bf16.msra.mxu1 %v1354_v33 }
  0x8f   :  { %1252 = vmatprep.subr.bf16.mxu1 %v1487_v25 }
  0x90   :  { %1233 = vmatpush3.bf16.msra.mxu0 %v1347_v26 }
  0x91   :  { %1234 = vmatprep.subr.bf16.mxu0 %v1487_v25 }
  0x92   :  { %1253 = vmatpush3.bf16.msra.mxu1 %v1355_v34 }
  0x93   :  { %1254 = vmatprep.subr.bf16.mxu1 %v1487_v25 }
  0x94   :  { %1235 = vmatpush3.bf16.msra.mxu0 %v1348_v27 }
  0x95   :  { %1236 = vmatprep.subr.bf16.mxu0 %v1487_v25 }
  0x96   :  { %1255 = vmatpush3.bf16.msra.mxu1 %v1356_v35 }
  0x97   :  { %1256 = vmatprep.subr.bf16.mxu1 %v1487_v25 }
  0x98   :  { %1237 = vmatpush3.bf16.msra.mxu0 %v1349_v28 }
  0x99   :  { %1238 = vmatprep.subr.bf16.mxu0 %v1487_v25 }
  0x9a   :  { %1257 = vmatpush3.bf16.msra.mxu1 %v1357_v36 }
  0x9b   :  { %1258 = vmatprep.subr.bf16.mxu1 %v1487_v25 }
  0x9c   :  { %1239 = vmatpush3.bf16.msra.mxu0 %v1350_v29 }
  0x9d   :  { %1240 = vmatprep.subr.bf16.mxu0 %v1487_v25 }
  0x9e   :  { %1259 = vmatpush3.bf16.msra.mxu1 %v1358_v37 }
  0x9f   :  { %1260 = vmatprep.subr.bf16.mxu1 %v1487_v25 }
  0xa0   :  { %1241 = vmatpush3.bf16.msra.mxu0 %v1351_v30 }
  0xa1   :  { %1242 = vmatprep.subr.bf16.mxu0 %v1487_v25 }
  0xa2   :  { %1261 = vmatpush3.bf16.msra.mxu1 %v1359_v38 }
  0xa3   :  { %1262 = vmatprep.subr.bf16.mxu1 %v1487_v25 }
  0xa4   :  { %1243 = vmatpush3.bf16.msra.mxu0 %v1352_v31 }
  0xa5   :  { %1244 = vmatprep.subr.bf16.mxu0 %v1487_v25 }
  0xa6   :  { %1263 = vmatpush3.bf16.msra.mxu1 %v1360_v11 }
  0xa7   :  { %1264 = vmatprep.subr.bf16.mxu1 %v1487_v25 }
  0xa8   :  { %1245 = vmatpush3.bf16.msra.mxu0 %v1353_v32 }
  0xaa   :  { %1265 = vmatpush3.bf16.msra.mxu1 %v1361_v12 }
 0x13e   :  { %v1140_v39 = vpop.f32.mrb[0].mxu0 }
 0x13f   :  { %v1162_v40 = vpop.f32.mrb[0].mxu1  ;;  %v1141_v42 = vpop.f32.mrb[1].mxu0 }
 0x140   :  { %v1142_v43 = vadd.f32 %v1141_v42, %v1140_v39  ;;  %v1163_v44 = vpop.f32.mrb[1].mxu1  ;;  %v1143_v45 = vpop.f32.mrb[2].mxu0 }
 0x141   :  { %v1164_v46 = vadd.f32 %v1163_v44, %v1162_v40  ;;  %v1165_v47 = vpop.f32.mrb[2].mxu1  ;;  %v1144_v48 = vpop.f32.mrb[3].mxu0 }
 0x142   :  { %v661_v49 = vadd.f32 %v1142_v43, %v1041_v41  ;;  %v1145_v50 = vadd.f32 %v1144_v48, %v1143_v45  ;;  %v1166_v51 = vpop.f32.mrb[3].mxu1 }
 0x143   :  { %v1167_v52 = vadd.f32 %v1166_v51, %v1165_v47 }
 0x144   :  { %v702_v53 = vadd.f32 %v1164_v46, %v661_v49  ;;  %v664_v54 = vadd.f32 %v1145_v50, %v1041_v41 }
 0x146   :  { %v705_v55 = vadd.f32 %v1167_v52, %v664_v54 }
 0x15e   :  { %v1184_v56 = vpop.f32.mrb[4].mxu0 }
 0x15f   :  { %v1206_v57 = vpop.f32.mrb[4].mxu1  ;;  %v1185_v58 = vpop.f32.mrb[5].mxu0 }
 0x160   :  { %v1186_v59 = vadd.f32 %v1185_v58, %v1184_v56  ;;  %v1207_v60 = vpop.f32.mrb[5].mxu1  ;;  %v1187_v61 = vpop.f32.mrb[6].mxu0 }
 0x161   :  { %v1208_v62 = vadd.f32 %v1207_v60, %v1206_v57  ;;  %v1209_v63 = vpop.f32.mrb[6].mxu1  ;;  %v1188_v0 = vpop.f32.mrb[7].mxu0 }
 0x162   :  { %v743_v1 = vadd.f32 %v1186_v59, %v702_v53  ;;  %v1189_v2 = vadd.f32 %v1188_v0, %v1187_v61  ;;  %v1210_v3 = vpop.f32.mrb[7].mxu1 }
 0x163   :  { %v1211_v4 = vadd.f32 %v1210_v3, %v1209_v63 }
 0x164   :  { %v784_v5 = vadd.f32 %v1208_v62, %v743_v1  ;;  %v746_v6 = vadd.f32 %v1189_v2, %v705_v55 }
 0x166   :  { %v787_v7 = vadd.f32 %v1211_v4, %v746_v6  ;;  %v790_v8 = vmax.f32 %v784_v5, 0.0 }
 0x168   :  { %v791_v9 = vmax.f32 %v787_v7, 0.0 }
 0x16a   :  { %v792_v10 = vpack.c.bf16 %v791_v9, %v790_v8 }
 0x16c   :  { %1247 = vmatmul.mubr.bf16.vlgmr.msra.gmra.mrb[8].mxu0 %v792_v10 }
 0x23f   :  { %v898_v14 = vpop.f32.mrb[8].mxu0 }
 0x240   :  { %v899_v15 = vadd.f32 %v1106_v13, %v898_v14  ;;  %v1248_v16 = vpop.f32.mrb[9].mxu0 }
 0x241   :  { %v901_v17 = vpop.f32.mrb[10].mxu0 }
 0x242   :  { %v902_v18 = vadd.f32 %v1106_v13, %v901_v17  ;;  %v1249_v19 = vpop.f32.mrb[11].mxu0  ;;  %v905_v20 = vmax.f32 %v899_v15, 0.0 }
 0x244   :  { %v906_v21 = vmax.f32 %v902_v18, 0.0 }
 0x246   :  { %v907_v22 = vpack.c.bf16 %v906_v21, %v905_v20 }
 0x248   :  { %1267 = vmatmul.mubr.bf16.vlgmr.msra.gmra.mrb[8].mxu1 %v907_v22 }
 0x31b   :  { %v1013_v24 = vpop.f32.mrb[8].mxu1 }
 0x31c   :  { %v1014_v25 = vadd.f32 %v1115_v23, %v1013_v24  ;;  %v1268_v26 = vpop.f32.mrb[9].mxu1 }
 0x31d   :  { %v1016_v27 = vpop.f32.mrb[10].mxu1 }
 0x31e   :  { %1020 = vst [vmem:[#allocation10] sm:$0xff] %v1014_v25  ;;  %v1017_v28 = vadd.f32 %v1115_v23, %v1016_v27  ;;  %v1269_v29 = vpop.f32.mrb[11].mxu1 }
 0x320   :  { %1021 = vst [vmem:[#allocation10 + $0x8] sm:$0xff] %v1017_v28 }
 0x321   :  { %1461 = shalt.err (!%p1458_p8)
}
 0x322   :  { %s1462_s9 = scalar_lea.hbm %s1636_s7, 256 }
 0x323   :  { %p1463_p9 = scmp.ne.s32.totalorder %s1636_s7, %s1462_s9  ;;  %p1466_p10 = scmp.lt.u32.totalorder %s1462_s9, %s1636_s7 }
 0x325   :  { %p1468_p11 = pnand %p1466_p10, %p1463_p9 }
 0x327   :  { %1471 = shalt.err (!%p1468_p11)
}
 0x328   :  { %s1490_s17 = smov 128   ;;  %s1491_s0 = smov 8  }
 0x329   :  { %1033 = dma.vmem_to_hbm [thread:$0]  %s1028_s30, 256, %s1636_s7, [#allocation4], %s1490_s17, %s1490_s17, %s1491_s0  }
 0x32a   :  { %1478 = dma.done.wait [#allocation4], 256  }
 0x32b   :  { %1479 = vsyncadd [#allocation4], 4294967040 }
 0x32c   :  { %1037 = vsyncpa [#allocation3], 1 }
 0x32d   :  { %1038 = vsyncpa [#allocation6], 1 }
 0x32e   :  { %1039 = vsyncpa [#allocation9], 1 }
 0x32f   :  { %1040 = vsyncpa [#allocation4], 1 }

</bundles_post_ra>
